<compile_context>
chip_gen: v6e
topology: v6e:2x2x1
jax: 0.10.0
libtpu: 0.0.40
codegen_flags: <defaults>
</compile_context>

<pallas_src>
import functools

import jax
import jax.numpy as jnp
import numpy as np
from jax.experimental import pallas as pl
from jax.experimental.pallas import tpu as pltpu

EPS = 1e-5          # nn.BatchNorm2d default eps
LANE = 128          # channel padding target (lane-dense stores)
_HEADROOM = 4 << 20

# centre tap first -> the 1x1 downsample reads taps[:, :Cin] at lane offset 0.
_TAP_ORDER = ((1, 1), (0, 0), (0, 1), (0, 2), (1, 0), (1, 2), (2, 0), (2, 1), (2, 2))


# ---------------------------------------------------------------------------
# Pallas kernels (all operate on (row_tile, C) tiles of a (P, C) view)
# ---------------------------------------------------------------------------
def _conv_stats_kernel(taps_ref, w_ref, z_ref, sum_ref, ssq_ref):
    """3x3 conv as ONE MXU matmul (K = 9*Cin) + per-tile BN partial sums."""
    z = jnp.dot(taps_ref[...], w_ref[...], preferred_element_type=jnp.float32)
    z_ref[...] = z.astype(z_ref.dtype)
    sum_ref[...] = jnp.sum(z, axis=0, keepdims=True)[None]
    ssq_ref[...] = jnp.sum(z * z, axis=0, keepdims=True)[None]


def _conv_ds_stats_kernel(taps_ref, w_ref, wd_ref,
                          z_ref, sum_ref, ssq_ref,
                          zd_ref, sumd_ref, ssqd_ref, *, cin):
    """conv1 + 1x1 downsample conv (fed from the centre tap == strided x) + BN partials."""
    taps = taps_ref[...]
    z = jnp.dot(taps, w_ref[...], preferred_element_type=jnp.float32)
    z_ref[...] = z.astype(z_ref.dtype)
    sum_ref[...] = jnp.sum(z, axis=0, keepdims=True)[None]
    ssq_ref[...] = jnp.sum(z * z, axis=0, keepdims=True)[None]

    xc = taps[:, :cin]                       # centre tap group, lane offset 0
    zd = jnp.dot(xc, wd_ref[...], preferred_element_type=jnp.float32)
    zd_ref[...] = zd.astype(zd_ref.dtype)
    sumd_ref[...] = jnp.sum(zd, axis=0, keepdims=True)[None]
    ssqd_ref[...] = jnp.sum(zd * zd, axis=0, keepdims=True)[None]


def _bn_relu_conv_stats_kernel(taps_ref, s9_ref, b9_ref, w_ref,
                               z_ref, sum_ref, ssq_ref):
    """Fused BN1-apply + ReLU on conv2's taps, then conv2 matmul + BN2 partial sums."""
    a = taps_ref[...].astype(jnp.float32) * s9_ref[...] + b9_ref[...]
    a = jnp.maximum(a, 0.0).astype(taps_ref.dtype)
    z = jnp.dot(a, w_ref[...], preferred_element_type=jnp.float32)
    z_ref[...] = z.astype(z_ref.dtype)
    sum_ref[...] = jnp.sum(z, axis=0, keepdims=True)[None]
    ssq_ref[...] = jnp.sum(z * z, axis=0, keepdims=True)[None]


def _affine_add_relu_kernel(z_ref, scale_ref, shift_ref, idn_ref, o_ref):
    """BN2 apply + identity residual + ReLU (elementwise math in f32)."""
    y = (z_ref[...].astype(jnp.float32) * scale_ref[...] + shift_ref[...]
         + idn_ref[...].astype(jnp.float32))
    o_ref[...] = jnp.maximum(y, 0.0).astype(o_ref.dtype)


def _affine2_add_relu_kernel(z_ref, scale_ref, shift_ref,
                             zd_ref, scaled_ref, shiftd_ref, o_ref):
    """BN2 apply + BN'd 1x1-downsample residual + ReLU."""
    y = (z_ref[...].astype(jnp.float32) * scale_ref[...] + shift_ref[...]
         + zd_ref[...].astype(jnp.float32) * scaled_ref[...] + shiftd_ref[...])
    o_ref[...] = jnp.maximum(y, 0.0).astype(o_ref.dtype)


# ---------------------------------------------------------------------------
# wrapper helpers (plain JAX: layout, im2col, O(C) BN finalize, VMEM sizing)
# ---------------------------------------------------------------------------
def _round_up(a, m):
    return (a + m - 1) // m * m


def _cdiv(a, b):
    return -(-a // b)


def _taps_3x3(img, stride, oh, ow, pad_value=None):
    """im2col: nine shifted windows (in _TAP_ORDER) concatenated along channels.

    `pad_value` (per-channel, shape (C,)) replaces the usual zero padding; used to
    emulate h1's zero border when BN1+ReLU is applied to the taps inside the kernel.
    """
    n, h, w, c = img.shape
    if pad_value is None:
        xp = jnp.pad(img, ((0, 0), (1, 1), (1, 1), (0, 0)))
    else:
        xp = jnp.broadcast_to(pad_value.astype(img.dtype).reshape(1, 1, 1, c),
                              (n, h + 2, w + 2, c))
        xp = xp.at[:, 1:-1, 1:-1, :].set(img)
    cols = []
    for dy, dx in _TAP_ORDER:
        sl = xp[:, dy:dy + stride * (oh - 1) + 1:stride,
                   dx:dx + stride * (ow - 1) + 1:stride, :]
        cols.append(sl.reshape(n * oh * ow, c))
    return jnp.concatenate(cols, axis=1)


def _w_matrix(w, cp, dtype):
    """(3,3,Cin,Cout) HWIO -> (9*Cin, Cp) in _TAP_ORDER row order, zero-padded to Cp."""
    cout = w.shape[-1]
    mat = jnp.concatenate([w[dy, dx] for dy, dx in _TAP_ORDER], axis=0)
    return jnp.pad(mat.astype(jnp.float32), ((0, 0), (0, cp - cout))).astype(dtype)


def _pad_vec(v, cp):
    v = v.reshape(1, -1).astype(jnp.float32)
    return jnp.pad(v, ((0, 0), (0, cp - v.shape[1])))


def _bn_scale_shift(sums, ssqs, gamma, beta, count):
    """Per-tile (sum, sumsq) partials -> per-channel BN scale/shift.  O(C) work."""
    s = jnp.sum(sums, axis=0)                       # (1, Cp)
    sq = jnp.sum(ssqs, axis=0)                      # (1, Cp)
    mean = s / count
    var = jnp.maximum(sq / count - mean * mean, 0.0)
    scale = gamma * jax.lax.rsqrt(var + EPS)
    shift = beta - mean * scale
    return scale, shift


def _vmem_budget():
    """Generation-aware VMEM budget (<= ~3/4 of physical, with margin)."""
    try:
        cap = int(pltpu.get_tpu_info().vmem_capacity_bytes)
    except Exception:
        cap = 64 << 20                               # conservative (v7x)
    return max(min(cap * 3 // 4, cap - (12 << 20)), 16 << 20)


def _block_bytes(blocks):
    return sum(int(np.prod(s)) * np.dtype(d).itemsize for s, d in blocks)


def _compiler_params(blocks, budget):
    """blocks: exact list of (shape, dtype) for every in/out block of the call."""
    need = 2 * _block_bytes(blocks) + _HEADROOM      # 2x = double buffering
    return pltpu.CompilerParams(
        dimension_semantics=("parallel",),           # tiles are independent
        vmem_limit_bytes=int(min(max(need, 32 << 20), budget)),
    )


# ---------------------------------------------------------------------------
# forward
# ---------------------------------------------------------------------------
def res_block_forward(x_nchw, params, stride=1, *,
                      row_tile=None, compute_dtype=jnp.bfloat16):
    w1, g1, b1, w2, g2, b2, wd, gd, bd = params
    n, cin, h, w = x_nchw.shape
    cout = w1.shape[-1]
    oh = (h - 1) // stride + 1
    ow = (w - 1) // stride + 1
    p = n * oh * ow
    cp = _round_up(cout, LANE)                       # lane-dense channel padding
    has_ds = (stride != 1) or (cin != cout)
    cdt = compute_dtype
    cb = np.dtype(cdt).itemsize
    k1, k2 = 9 * cin, 9 * cout

    # ---- generation-aware tile selection ----
    budget = _vmem_budget()
    if row_tile is None:
        row_tile = 1024 if budget >= (80 << 20) else 512   # v5e/v6e vs v7x
    row_bytes = max((k1 + cp + (cp if has_ds else 0)) * cb,     # pass A
                    (k2 + cp) * cb,                             # pass C
                    3 * cp * cb)                                # pass D
    fixed_bytes = max((k1 * cp + (cin * cp if has_ds else 0)) * cb + 4 * cp * 4,
                      k2 * cp * cb + 2 * k2 * 4 + 2 * cp * 4,
                      4 * cp * 4)
    tp = min(row_tile, _round_up(p, 16), max(16, _round_up(_cdiv(p, 4), 16)))
    tp = _round_up(tp, 16)
    while tp > 16 and 2 * (tp * row_bytes + fixed_bytes) + _HEADROOM > budget:
        tp = max(16, _round_up(tp // 2, 16))
    p_pad = _round_up(p, tp)
    nt = p_pad // tp

    # ---- layout: NCHW -> NHWC, cast to compute dtype BEFORE im2col ----
    x = jnp.transpose(x_nchw, (0, 2, 3, 1)).astype(cdt)

    # common specs / shapes
    row_spec = pl.BlockSpec((tp, cp), lambda i: (i, 0))
    st_spec = pl.BlockSpec((1, 1, cp), lambda i: (i, 0, 0))
    vec_spec = pl.BlockSpec((1, cp), lambda i: (0, 0))
    z_sh = jax.ShapeDtypeStruct((p_pad, cp), cdt)
    st_sh = jax.ShapeDtypeStruct((nt, 1, cp), jnp.float32)

    # -------- pass A: conv1 (+ 1x1 downsample) + BN partial statistics --------
    taps1 = _taps_3x3(x, stride, oh, ow)                     # (P, 9*Cin), compute dtype
    taps1 = jnp.pad(taps1, ((0, p_pad - p), (0, 0)))
    w1m = _w_matrix(w1, cp, cdt)

    taps1_spec = pl.BlockSpec((tp, k1), lambda i: (i, 0))
    w1_spec = pl.BlockSpec((k1, cp), lambda i: (0, 0))
    blk_a = [((tp, k1), cdt), ((k1, cp), cdt), ((tp, cp), cdt),
             ((1, 1, cp), jnp.float32), ((1, 1, cp), jnp.float32)]

    if has_ds:
        wdm = jnp.pad(wd.astype(jnp.float32), ((0, 0), (0, cp - cout))).astype(cdt)
        wd_spec = pl.BlockSpec((cin, cp), lambda i: (0, 0))
        z1, s1, q1, zd, sd, qd = pl.pallas_call(
            functools.partial(_conv_ds_stats_kernel, cin=cin),
            grid=(nt,),
            in_specs=[taps1_spec, w1_spec, wd_spec],
            out_specs=(row_spec, st_spec, st_spec, row_spec, st_spec, st_spec),
            out_shape=(z_sh, st_sh, st_sh, z_sh, st_sh, st_sh),
            compiler_params=_compiler_params(
                blk_a + [((cin, cp), cdt), ((tp, cp), cdt),
                         ((1, 1, cp), jnp.float32), ((1, 1, cp), jnp.float32)], budget),
        )(taps1, w1m, wdm)
    else:
        z1, s1, q1 = pl.pallas_call(
            _conv_stats_kernel,
            grid=(nt,),
            in_specs=[taps1_spec, w1_spec],
            out_specs=(row_spec, st_spec, st_spec),
            out_shape=(z_sh, st_sh, st_sh),
            compiler_params=_compiler_params(blk_a, budget),
        )(taps1, w1m)
        zd = sd = qd = None

    # -------- BN1 finalize (O(C)) --------
    scale1, shift1 = _bn_scale_shift(s1, q1, _pad_vec(g1, cp), _pad_vec(b1, cp), float(p))
    sc1 = scale1[0, :cout]
    sh1 = shift1[0, :cout]
    # padding value that maps to exactly 0 after (x*scale + shift) then ReLU, so the
    # fused-in-kernel BN1+ReLU reproduces conv2's zero-padded h1 border.
    pad_val = -sh1 / jnp.where(sc1 == 0.0, 1.0, sc1)

    # -------- pass C: fused BN1-apply + ReLU + conv2 + BN2 partial statistics --------
    z1_img = z1[:p, :cout].reshape(n, oh, ow, cout)
    taps2 = _taps_3x3(z1_img, 1, oh, ow, pad_value=pad_val)  # (P, 9*Cout), compute dtype
    if p_pad > p:
        pad_rows = jnp.broadcast_to(jnp.tile(pad_val, 9).astype(cdt), (p_pad - p, k2))
        taps2 = jnp.concatenate([taps2, pad_rows], axis=0)
    w2m = _w_matrix(w2, cp, cdt)
    scale9 = jnp.tile(sc1.reshape(1, -1), (1, 9))            # (1, 9*Cout) f32
    shift9 = jnp.tile(sh1.reshape(1, -1), (1, 9))

    taps2_spec = pl.BlockSpec((tp, k2), lambda i: (i, 0))
    vec9_spec = pl.BlockSpec((1, k2), lambda i: (0, 0))
    w2_spec = pl.BlockSpec((k2, cp), lambda i: (0, 0))

    z2, s2, q2 = pl.pallas_call(
        _bn_relu_conv_stats_kernel,
        grid=(nt,),
        in_specs=[taps2_spec, vec9_spec, vec9_spec, w2_spec],
        out_specs=(row_spec, st_spec, st_spec),
        out_shape=(z_sh, st_sh, st_sh),
        compiler_params=_compiler_params(
            [((tp, k2), cdt), ((1, k2), jnp.float32), ((1, k2), jnp.float32),
             ((k2, cp), cdt), ((tp, cp), cdt),
             ((1, 1, cp), jnp.float32), ((1, 1, cp), jnp.float32)], budget),
    )(taps2, scale9, shift9, w2m)

    # -------- BN2 finalize + pass D: apply + residual add + ReLU --------
    scale2, shift2 = _bn_scale_shift(s2, q2, _pad_vec(g2, cp), _pad_vec(b2, cp), float(p))
    out_sh = jax.ShapeDtypeStruct((p_pad, cp), cdt)

    if has_ds:
        scaled, shiftd = _bn_scale_shift(sd, qd, _pad_vec(gd, cp), _pad_vec(bd, cp),
                                         float(p))
        out = pl.pallas_call(
            _affine2_add_relu_kernel,
            grid=(nt,),
            in_specs=[row_spec, vec_spec, vec_spec, row_spec, vec_spec, vec_spec],
            out_specs=row_spec,
            out_shape=out_sh,
            compiler_params=_compiler_params(
                [((tp, cp), cdt)] * 3 + [((1, cp), jnp.float32)] * 4, budget),
        )(z2, scale2, shift2, zd, scaled, shiftd)
    else:
        idn = jnp.pad(x.reshape(p, cin), ((0, p_pad - p), (0, cp - cin)))
        out = pl.pallas_call(
            _affine_add_relu_kernel,
            grid=(nt,),
            in_specs=[row_spec, vec_spec, vec_spec, row_spec],
            out_specs=row_spec,
            out_shape=out_sh,
            compiler_params=_compiler_params(
                [((tp, cp), cdt)] * 3 + [((1, cp), jnp.float32)] * 2, budget),
        )(z2, scale2, shift2, idn)

    out = out[:p, :cout].reshape(n, oh, ow, cout)
    return jnp.transpose(out, (0, 3, 1, 2))                  # NHWC -> NCHW (compute dtype)


# ---------------------------------------------------------------------------
# pure-JAX reference (for correctness checking only)
# ---------------------------------------------------------------------------
def _ref_forward(x_nchw, params, stride=1):
    w1, g1, b1, w2, g2, b2, wd, gd, bd = params
    cin, cout = w1.shape[2], w1.shape[3]
    x = jnp.transpose(x_nchw, (0, 2, 3, 1)).astype(jnp.float32)

    def conv3(xx, ww, s):
        return jax.lax.conv_general_dilated(
            xx, ww, (s, s), ((1, 1), (1, 1)),
            dimension_numbers=("NHWC", "HWIO", "NHWC"))

    def bn(xx, g, b):
        m = xx.mean((0, 1, 2), keepdims=True)
        v = ((xx - m) ** 2).mean((0, 1, 2), keepdims=True)
        return (xx - m) / jnp.sqrt(v + EPS) * g.reshape(1, 1, 1, -1) + b.reshape(1, 1, 1, -1)

    h1 = jax.nn.relu(bn(conv3(x, w1, stride), g1, b1))
    y2 = bn(conv3(h1, w2, 1), g2, b2)
    if stride != 1 or cin != cout:
        ident = jax.lax.conv_general_dilated(
            x, wd.reshape(1, 1, cin, cout), (stride, stride), ((0, 0), (0, 0)),
            dimension_numbers=("NHWC", "HWIO", "NHWC"))
        ident = bn(ident, gd, bd)
    else:
        ident = x
    out = jax.nn.relu(y2 + ident)
    return jnp.transpose(out, (0, 3, 1, 2))


# ---------------------------------------------------------------------------
# main
# ---------------------------------------------------------------------------
def _make_params(key, cin, cout):
    k1, k2, k3 = jax.random.split(key, 3)
    w1 = jax.random.normal(k1, (3, 3, cin, cout), jnp.float32) * 0.1   # conv1 (HWIO)
    w2 = jax.random.normal(k2, (3, 3, cout, cout), jnp.float32) * 0.1  # conv2 (HWIO)
    wd = jax.random.normal(k3, (cin, cout), jnp.float32) * 0.1         # 1x1 downsample
    g1 = jnp.ones((cout,), jnp.float32); b1 = jnp.zeros((cout,), jnp.float32)
    g2 = jnp.ones((cout,), jnp.float32); b2 = jnp.zeros((cout,), jnp.float32)
    gd = jnp.ones((cout,), jnp.float32); bd = jnp.zeros((cout,), jnp.float32)
    return (w1, g1, b1, w2, g2, b2, wd, gd, bd)


if __name__ == "__main__":
    key = jax.random.PRNGKey(0)

    # (name, Cin, Cout, stride, MXU compute dtype, tolerance)
    configs = [
        ("downsample 4->8  s1 f32 ", 4, 8, 1, jnp.float32, 5e-3),
        ("downsample 4->8  s1 bf16", 4, 8, 1, jnp.bfloat16, 5e-2),
        ("identity   8->8  s1 f32 ", 8, 8, 1, jnp.float32, 5e-3),
        ("downsample 4->8  s2 f32 ", 4, 8, 2, jnp.float32, 5e-3),
    ]

    for name, cin, cout, stride, cdt, tol in configs:
        key, kp, kx = jax.random.split(key, 3)
        params = _make_params(kp, cin, cout)
        x = jax.random.normal(kx, (2, cin, 16, 16), jnp.float32)

        out = res_block_forward(x, params, stride=stride, compute_dtype=cdt)
        out = jax.block_until_ready(out)

        ref = _ref_forward(x, params, stride=stride)
        assert out.shape == ref.shape == (2, cout, 16 // stride, 16 // stride), name
        err = float(jnp.max(jnp.abs(out.astype(jnp.float32) - ref)))
        assert jnp.allclose(out.astype(jnp.float32), ref, atol=tol, rtol=tol), \
            f"{name}: max abs diff {err}"

    print("KERNEL_OK")
</pallas_src>

<mosaic_0001>
module attributes {stable_mosaic.version = 11 : i64} {
  func.func @_conv_ds_stats_kernel(%arg0: i32, %arg1: memref<128x36xf32, #tpu.memory_space<vmem>>, %arg2: memref<36x128xf32, #tpu.memory_space<vmem>>, %arg3: memref<4x128xf32, #tpu.memory_space<vmem>>, %arg4: memref<128x128xf32, #tpu.memory_space<vmem>>, %arg5: memref<1x1x128xf32, #tpu.memory_space<vmem>>, %arg6: memref<1x1x128xf32, #tpu.memory_space<vmem>>, %arg7: memref<128x128xf32, #tpu.memory_space<vmem>>, %arg8: memref<1x1x128xf32, #tpu.memory_space<vmem>>, %arg9: memref<1x1x128xf32, #tpu.memory_space<vmem>>) attributes {dimension_semantics = [#tpu.dimension_semantics<parallel>], iteration_bounds = array<i64: 4>, scalar_prefetch = 0 : i64, scratch_operands = 0 : i64, tpu.core_type = #tpu.core_type<tc>, window_params = [{transform_indices = @transform_0, window_bounds = array<i64: 128, 36>}, {pipeline_mode = #tpu.pipeline_mode<synchronous>, transform_indices = @transform_1, window_bounds = array<i64: 36, 128>}, {pipeline_mode = #tpu.pipeline_mode<synchronous>, transform_indices = @transform_2, window_bounds = array<i64: 4, 128>}, {transform_indices = @transform_3, window_bounds = array<i64: 128, 128>}, {transform_indices = @transform_4, window_bounds = array<i64: 1, 1, 128>}, {transform_indices = @transform_5, window_bounds = array<i64: 1, 1, 128>}, {transform_indices = @transform_6, window_bounds = array<i64: 128, 128>}, {transform_indices = @transform_7, window_bounds = array<i64: 1, 1, 128>}, {transform_indices = @transform_8, window_bounds = array<i64: 1, 1, 128>}]} {
    %c0 = arith.constant 0 : index
    %c0_0 = arith.constant 0 : index
    %0 = vector.load %arg1[%c0, %c0_0] : memref<128x36xf32, #tpu.memory_space<vmem>>, vector<128x36xf32>
    %c0_1 = arith.constant 0 : index
    %c0_2 = arith.constant 0 : index
    %1 = vector.load %arg2[%c0_1, %c0_2] : memref<36x128xf32, #tpu.memory_space<vmem>>, vector<36x128xf32>
    %cst = arith.constant dense<0.000000e+00> : vector<128x128xf32>
    %2 = tpu.matmul %0, %1, %cst {dimension_numbers = #tpu.dot_dimension_numbers<[1], [0], [0], [1], [0, 0, 1, 1], [], []>} : vector<128x36xf32>, vector<36x128xf32>, vector<128x128xf32> -> vector<128x128xf32>
    %c0_3 = arith.constant 0 : index
    %c0_4 = arith.constant 0 : index
    %3 = vector.load %arg4[%c0_3, %c0_4] : memref<128x128xf32, #tpu.memory_space<vmem>>, vector<128x128xf32>
    tpu.vector_store %arg4[%c0_3, %c0_4], %2 {strides = array<i32>} : memref<128x128xf32, #tpu.memory_space<vmem>>, vector<128x128xf32>,
    %cst_5 = arith.constant dense<0.000000e+00> : vector<128xf32>
    %4 = vector.multi_reduction <add>, %2, %cst_5 [0] : vector<128x128xf32> to vector<128xf32>
    %5 = vector.shape_cast %4 : vector<128xf32> to vector<1x128xf32>
    %6 = vector.shape_cast %5 : vector<1x128xf32> to vector<1x1x128xf32>
    %c0_6 = arith.constant 0 : index
    %c0_7 = arith.constant 0 : index
    %c0_8 = arith.constant 0 : index
    %7 = vector.load %arg5[%c0_6, %c0_7, %c0_8] : memref<1x1x128xf32, #tpu.memory_space<vmem>>, vector<1x1x128xf32>
    tpu.vector_store %arg5[%c0_6, %c0_7, %c0_8], %6 {strides = array<i32>} : memref<1x1x128xf32, #tpu.memory_space<vmem>>, vector<1x1x128xf32>,
    %8 = arith.mulf %2, %2 : vector<128x128xf32>
    %cst_9 = arith.constant dense<0.000000e+00> : vector<128xf32>
    %9 = vector.multi_reduction <add>, %8, %cst_9 [0] : vector<128x128xf32> to vector<128xf32>
    %10 = vector.shape_cast %9 : vector<128xf32> to vector<1x128xf32>
    %11 = vector.shape_cast %10 : vector<1x128xf32> to vector<1x1x128xf32>
    %c0_10 = arith.constant 0 : index
    %c0_11 = arith.constant 0 : index
    %c0_12 = arith.constant 0 : index
    %12 = vector.load %arg6[%c0_10, %c0_11, %c0_12] : memref<1x1x128xf32, #tpu.memory_space<vmem>>, vector<1x1x128xf32>
    tpu.vector_store %arg6[%c0_10, %c0_11, %c0_12], %11 {strides = array<i32>} : memref<1x1x128xf32, #tpu.memory_space<vmem>>, vector<1x1x128xf32>,
    %13 = vector.extract_strided_slice %0 {offsets = [0, 0], sizes = [128, 4], strides = [1, 1]} : vector<128x36xf32> to vector<128x4xf32>
    %c0_13 = arith.constant 0 : index
    %c0_14 = arith.constant 0 : index
    %14 = vector.load %arg3[%c0_13, %c0_14] : memref<4x128xf32, #tpu.memory_space<vmem>>, vector<4x128xf32>
    %cst_15 = arith.constant dense<0.000000e+00> : vector<128x128xf32>
    %15 = tpu.matmul %13, %14, %cst_15 {dimension_numbers = #tpu.dot_dimension_numbers<[1], [0], [0], [1], [0, 0, 1, 1], [], []>} : vector<128x4xf32>, vector<4x128xf32>, vector<128x128xf32> -> vector<128x128xf32>
    %c0_16 = arith.constant 0 : index
    %c0_17 = arith.constant 0 : index
    %16 = vector.load %arg7[%c0_16, %c0_17] : memref<128x128xf32, #tpu.memory_space<vmem>>, vector<128x128xf32>
    tpu.vector_store %arg7[%c0_16, %c0_17], %15 {strides = array<i32>} : memref<128x128xf32, #tpu.memory_space<vmem>>, vector<128x128xf32>,
    %cst_18 = arith.constant dense<0.000000e+00> : vector<128xf32>
    %17 = vector.multi_reduction <add>, %15, %cst_18 [0] : vector<128x128xf32> to vector<128xf32>
    %18 = vector.shape_cast %17 : vector<128xf32> to vector<1x128xf32>
    %19 = vector.shape_cast %18 : vector<1x128xf32> to vector<1x1x128xf32>
    %c0_19 = arith.constant 0 : index
    %c0_20 = arith.constant 0 : index
    %c0_21 = arith.constant 0 : index
    %20 = vector.load %arg8[%c0_19, %c0_20, %c0_21] : memref<1x1x128xf32, #tpu.memory_space<vmem>>, vector<1x1x128xf32>
    tpu.vector_store %arg8[%c0_19, %c0_20, %c0_21], %19 {strides = array<i32>} : memref<1x1x128xf32, #tpu.memory_space<vmem>>, vector<1x1x128xf32>,
    %21 = arith.mulf %15, %15 : vector<128x128xf32>
    %cst_22 = arith.constant dense<0.000000e+00> : vector<128xf32>
    %22 = vector.multi_reduction <add>, %21, %cst_22 [0] : vector<128x128xf32> to vector<128xf32>
    %23 = vector.shape_cast %22 : vector<128xf32> to vector<1x128xf32>
    %24 = vector.shape_cast %23 : vector<1x128xf32> to vector<1x1x128xf32>
    %c0_23 = arith.constant 0 : index
    %c0_24 = arith.constant 0 : index
    %c0_25 = arith.constant 0 : index
    %25 = vector.load %arg9[%c0_23, %c0_24, %c0_25] : memref<1x1x128xf32, #tpu.memory_space<vmem>>, vector<1x1x128xf32>
    tpu.vector_store %arg9[%c0_23, %c0_24, %c0_25], %24 {strides = array<i32>} : memref<1x1x128xf32, #tpu.memory_space<vmem>>, vector<1x1x128xf32>,
    return
  }
  func.func @transform_0(%arg0: i32) -> (i32, i32) {
    %c0_i32 = arith.constant 0 : i32
    %c0_i32_0 = arith.constant 0 : i32
    return %arg0, %c0_i32 : i32, i32
  }
  func.func @transform_1(%arg0: i32) -> (i32, i32) {
    %c0_i32 = arith.constant 0 : i32
    %c0_i32_0 = arith.constant 0 : i32
    %c0_i32_1 = arith.constant 0 : i32
    return %c0_i32, %c0_i32_0 : i32, i32
  }
  func.func @transform_2(%arg0: i32) -> (i32, i32) {
    %c0_i32 = arith.constant 0 : i32
    %c0_i32_0 = arith.constant 0 : i32
    %c0_i32_1 = arith.constant 0 : i32
    return %c0_i32, %c0_i32_0 : i32, i32
  }
  func.func @transform_3(%arg0: i32) -> (i32, i32) {
    %c0_i32 = arith.constant 0 : i32
    %c0_i32_0 = arith.constant 0 : i32
    return %arg0, %c0_i32 : i32, i32
  }
  func.func @transform_4(%arg0: i32) -> (i32, i32, i32) {
    %c0_i32 = arith.constant 0 : i32
    %c0_i32_0 = arith.constant 0 : i32
    %c0_i32_1 = arith.constant 0 : i32
    return %arg0, %c0_i32, %c0_i32_0 : i32, i32, i32
  }
  func.func @transform_5(%arg0: i32) -> (i32, i32, i32) {
    %c0_i32 = arith.constant 0 : i32
    %c0_i32_0 = arith.constant 0 : i32
    %c0_i32_1 = arith.constant 0 : i32
    return %arg0, %c0_i32, %c0_i32_0 : i32, i32, i32
  }
  func.func @transform_6(%arg0: i32) -> (i32, i32) {
    %c0_i32 = arith.constant 0 : i32
    %c0_i32_0 = arith.constant 0 : i32
    return %arg0, %c0_i32 : i32, i32
  }
  func.func @transform_7(%arg0: i32) -> (i32, i32, i32) {
    %c0_i32 = arith.constant 0 : i32
    %c0_i32_0 = arith.constant 0 : i32
    %c0_i32_1 = arith.constant 0 : i32
    return %arg0, %c0_i32, %c0_i32_0 : i32, i32, i32
  }
  func.func @transform_8(%arg0: i32) -> (i32, i32, i32) {
    %c0_i32 = arith.constant 0 : i32
    %c0_i32_0 = arith.constant 0 : i32
    %c0_i32_1 = arith.constant 0 : i32
    return %arg0, %c0_i32, %c0_i32_0 : i32, i32, i32
  }
}

</mosaic_0001>

<bundles_post_ra>
// kernel: tpu_custom_call.1
= control target key start
LH: loop header
LB: loop body
LE: loop exit
PB: predicated region body
PF: predicated region fallthrough
CT: control target
= control target key end

     0   :  { %s2086_s0 = inlined_call_operand.vmem [shape: f32[512,36], index: 0, kind: input, shape index: {}]   ;;  %s2087_s1 = inlined_call_operand.vmem [shape: f32[36,128], index: 1, kind: input, shape index: {}]   ;;  %s2088_s2 = inlined_call_operand.vmem [shape: f32[4,128], index: 2, kind: input, shape index: {}]   ;;  %s2089_s3 = inlined_call_operand.hbm [shape: f32[512,128], index: 3, kind: output, shape index: {0}]   ;;  %s2090_s4 = inlined_call_operand.hbm [shape: f32[4,1,128], index: 4, kind: output, shape index: {1}]   ;;  %s2091_s5 = inlined_call_operand.hbm [shape: f32[4,1,128], index: 5, kind: output, shape index: {2}]   ;;  %s2092_s6 = inlined_call_operand.hbm [shape: f32[512,128], index: 6, kind: output, shape index: {3}]   ;;  %s2093_s7 = inlined_call_operand.hbm [shape: f32[4,1,128], index: 7, kind: output, shape index: {4}]   ;;  %s2094_s8 = inlined_call_operand.hbm [shape: f32[4,1,128], index: 8, kind: output, shape index: {5}]  }
   0x1   :  { %2100 = sst [smem:[#allocation17_spill]] %s2086_s0 }
   0x2   :  { %2101 = sst [smem:[#allocation18_spill]] %s2087_s1 }
   0x3   :  { %2102 = sst [smem:[#allocation19_spill]] %s2088_s2 }
   0x4   :  { %2103 = sst [smem:[#allocation20_spill]] %s2089_s3 }
   0x5   :  { %2104 = sst [smem:[#allocation21_spill]] %s2092_s6 }
   0x6   :  { %14 = vsyncpa [#allocation3], 0 }
   0x7   :  { %16 = vsyncpa [#allocation3 + $0x1], 0 }
   0x8   :  { %17 = vsyncpa [#allocation5], 0 }
   0x9   :  { %19 = vsyncpa [#allocation5 + $0x1], 0 }
   0xa   :  { %20 = vsyncpa [#allocation8], 0 }
   0xb   :  { %22 = vsyncpa [#allocation8 + $0x1], 0 }
   0xc   :  { %23 = vsyncpa [#allocation11], 0 }
   0xd   :  { %25 = vsyncpa [#allocation11 + $0x1], 0  ;;  %s1682_s27 = smov 0   ;;  %s1684_s28 = smov 0  }
   0xe   :  { %s1686_s29 = smov 0   ;;  %s1688_s30 = smov 0  }
   0xf LB: > { %s1703_s9 = sadd.s32 4294967295, %s1627_s30   ;;  %s2095_s10 = sadd.s32 4294967294, %s1627_s30   ;;  %s1627_s30 = sphi %s1688_s30, %s2122_s30   ;;  %s1623_s29 = sphi %s1686_s29, %s2121_s29   ;;  %s1619_s28 = sphi %s1684_s28, %s2120_s28   ;;  %s1615_s27 = sphi %s1682_s27, %s2119_s27  }
  0x10   : > { %s1707_s11 = sadd.s32 1, %s1627_s30   ;;  %s106_s12 = sadd.s32 1, %s1623_s29 }
  0x11   : > { %s103_s13 = ssub.s32 %s1627_s30, %s1707_s11  ;;  %p116_p0 = scmp.ne.s32.totalorder %s1623_s29, %s1619_s28 }
  0x12   : > { %p104_p1 = scmp.eq.s32.totalorder %s103_s13, 0  ;;  %p117_p2 = scmp.eq.s32.totalorder %s1703_s9, 3 }
  0x13   : > { %p122_p3 = scmp.ne.s32.totalorder %s1619_s28, %s1615_s27  ;;  %p123_p4 = scmp.eq.s32.totalorder %s2095_s10, 3 }
  0x14   : > { %s1720_s14 = scalar_select %p104_p1, %s1623_s29, %s106_s12  }
  0x15   : > { %p1722_p5 = por %p117_p2, %p116_p0  ;;  %p1726_p6 = por %p123_p4, %p122_p3 }
  0x16   : > { %2105 = sst [smem:[#allocation16_spill]] %s1720_s14  ;;  %p1208_p7 = scmp.ge.s32.totalorder %s1627_s30, 1 }
  0x17   : > { %p286_p8 = scmp.lt.s32.totalorder %s1627_s30, 5 }
  0x19   : > { %p287_p9 = pnand %p1208_p7, %p286_p8 }
  0x1a   : > { %s2108_s1 = sld [smem:[#allocation18_spill]] (!%p287_p9)  ;;  %s1739_s21 = sshll.u32 (!%p287_p9), %s1703_s9, 4 }
  0x1b   : > { %290 = sbr.rel (%p287_p9) target bundleno = 400 (0x190), region = 32  ;;  %s2109_s2 = sld [smem:[#allocation19_spill]] (!%p287_p9) }
  0x1c   : > { %p342_p10 = scmp.lt.s32.totalorder (!%p287_p9), %s1739_s21, 63  ;;  %s2110_s0 = sld [smem:[#allocation17_spill]] (!%p287_p9) }
  0x1d   : > { %s1809_s24 = sand.u32 (!%p287_p9), 1, %s1619_s28   ;;  %s2096_s13 = sand.u32 (!%p287_p9), 1, %s1703_s9  }
  0x1e   : > { %s1209_s25 = sshll.u32 (!%p287_p9), %s1809_s24, 7  ;;  %s2111_s6 = sld [smem:[#allocation21_spill]] (!%p287_p9) }
  0x1f   : > { %s1815_s12 = scalar_lea.vmem (!%p287_p9), [#allocation2], %s1209_s25  ;;  %s2112_s3 = sld [smem:[#allocation20_spill]] (!%p287_p9) }
  0x20   : > { %v369_v0 = vld [vmem:[%s2108_s1 + $0x20] sm:$0xf]  ;;  %vm419_vm0 = vcmask 1043456   ;;  %v368_v1 = vld [vmem:[%s2108_s1 + $0x18] sm:$0xff]  ;;  %v367_v3 = vld [vmem:[%s2108_s1 + $0x10] sm:$0xff]  ;;  %s343_s26 = scalar_select %p342_p10, %s1739_s21, 63 }
  0x21   : > { %1299 = vmatprep.subr.msk.mxu0 %vm419_vm0, %v369_v0  ;;  %v644_v2 = vld [vmem:[%s2109_s2] sm:$0xf]  ;;  %v366_v4 = vld [vmem:[%s2108_s1 + $0x8] sm:$0xff]  ;;  %vm645_vm1 = vcmask 31744   ;;  %vm370_vm2 = vcmask 293888   ;;  %s937_s19 = sshll.u32 %s1815_s12, 4  ;;  %s1870_s19 = int_to_ptr.vmem [resolvable:$true] %s937_s19 }
  0x22   : > { %1300 = vmatpush3.msk.msra.mxu0 %vm419_vm0, %v369_v0  ;;  %1333 = vmatprep.subr.msk.mxu1 %vm419_vm0, %v644_v2  ;;  %s1212_s17 = sshll.u32 %s343_s26, 3  ;;  %v365_v5 = vld [vmem:[%s2108_s1] sm:$0xff]  ;;  %s1812_s26 = scalar_lea.vmem [#allocation7], %s1209_s25 }
  0x23   : > { %1301 = vmatprep.subr.mxu0 %v368_v1  ;;  %1334 = vmatpush3.msk.msra.mxu1 %vm419_vm0, %v644_v2  ;;  %s1755_s20 = scalar_lea.vmem %s2110_s0, %s1212_s17  ;;  %s1259_s17 = sshll.u32 %s1703_s9, 11 }
  0x24   : > { %1302 = vmatpush3.msra.mxu0 %v368_v1  ;;  %v349_v6 = vld [vmem:[%s1755_s20] sm:$0xff]  ;;  %v350_v7 = vld [vmem:[%s1755_s20 + $0x8] sm:$0xff]  ;;  %v351_v8 = vld [vmem:[%s1755_s20 + $0x10] sm:$0xff]  ;;  %s979_s18 = sshll.u32 %s1812_s26, 4  ;;  %s1854_s23 = scalar_lea.hbm %s2111_s6, %s1259_s17  ;;  %s1856_s18 = int_to_ptr.vmem [resolvable:$true] %s979_s18 }
  0x25   : > { %1303 = vmatprep.subr.mxu0 %v367_v3  ;;  %1335 = vmatprep.mubr.msk.f32.mxu1 %vm645_vm1, %v349_v6  ;;  %v352_v9 = vld [vmem:[%s1755_s20 + $0x18] sm:$0xff]  ;;  %v353_v10 = vld [vmem:[%s1755_s20 + $0x20] sm:$0xff]  ;;  %v354_v11 = vld [vmem:[%s1755_s20 + $0x28] sm:$0xff]  ;;  %s1868_s22 = scalar_lea.hbm %s2112_s3, %s1259_s17  ;;  %s1874_s10 = scalar_lea.sflag [#allocation8], %s2096_s13 }
  0x26   : > { %1304 = vmatpush3.msra.mxu0 %v367_v3  ;;  %1336 = vmatmul.mubr.msk.f32.vlgmr.msra.gmra.mxu1 %vm645_vm1, %v350_v7  ;;  %v355_v12 = vld [vmem:[%s1755_s20 + $0x30] sm:$0xff]  ;;  %v356_v13 = vld [vmem:[%s1755_s20 + $0x38] sm:$0xff]  ;;  %v357_v14 = vld [vmem:[%s1755_s20 + $0x40] sm:$0xff]  ;;  %s1425_s0 = scalar_lea.vmem %s1856_s18, 2048 }
  0x27   : > { %1305 = vmatprep.subr.mxu0 %v366_v4  ;;  %1309 = vmatprep.mubr.msk.f32.mxu0 %vm370_vm2, %v349_v6  ;;  %v358_v15 = vld [vmem:[%s1755_s20 + $0x48] sm:$0xff]  ;;  %v359_v16 = vld [vmem:[%s1755_s20 + $0x50] sm:$0xff]  ;;  %v360_v17 = vld [vmem:[%s1755_s20 + $0x58] sm:$0xff]  ;;  %p1426_p11 = scmp.ne.s32.totalorder %s1856_s18, %s1425_s0 }
  0x28   : > { %1306 = vmatpush3.msra.mxu0 %v366_v4  ;;  %1338 = vmatprep.mubr.msk.f32.mxu1 %vm645_vm1, %v351_v8  ;;  %v361_v18 = vld [vmem:[%s1755_s20 + $0x60] sm:$0xff]  ;;  %v362_v19 = vld [vmem:[%s1755_s20 + $0x68] sm:$0xff]  ;;  %v363_v20 = vld [vmem:[%s1755_s20 + $0x70] sm:$0xff] }
  0x29   : > { %1307 = vmatprep.subr.mxu0 %v365_v5  ;;  %v364_v21 = vld [vmem:[%s1755_s20 + $0x78] sm:$0xff]  ;;  %p1427_p12 = pnand %p1426_p11, %p1722_p5 }
  0x2a   : > { %1308 = vmatpush3.msra.mxu0 %v365_v5  ;;  %1339 = vmatmul.mubr.msk.f32.gmra.mxu1 %vm645_vm1, %v352_v9 }
  0x2b   : > { %1310 = vmatmul.mubr.msk.f32.vlgmr.msra.gmra.mxu0 %vm370_vm2, %v350_v7  ;;  %1341 = vmatprep.mubr.msk.f32.mxu1 %vm645_vm1, %v353_v10  ;;  %p1428_p13 = pneg %p1427_p12 }
  0x2c   : > { %1312 = vmatprep.mubr.msk.f32.mxu0 %vm370_vm2, %v351_v8 }
  0x2e   : > { %1342 = vmatmul.mubr.msk.f32.gmra.mxu1 %vm645_vm1, %v354_v11 }
  0x2f   : > { %1313 = vmatmul.mubr.msk.f32.gmra.mxu0 %vm370_vm2, %v352_v9  ;;  %1344 = vmatprep.mubr.msk.f32.mxu1 %vm645_vm1, %v355_v12 }
  0x30   : > { %1315 = vmatprep.mubr.msk.f32.mxu0 %vm370_vm2, %v353_v10 }
  0x32   : > { %1345 = vmatmul.mubr.msk.f32.gmra.mxu1 %vm645_vm1, %v356_v13 }
  0x33   : > { %1316 = vmatmul.mubr.msk.f32.gmra.mxu0 %vm370_vm2, %v354_v11  ;;  %1347 = vmatprep.mubr.msk.f32.mxu1 %vm645_vm1, %v357_v14 }
  0x34   : > { %1318 = vmatprep.mubr.msk.f32.mxu0 %vm370_vm2, %v355_v12 }
  0x36   : > { %1348 = vmatmul.mubr.msk.f32.gmra.mxu1 %vm645_vm1, %v358_v15 }
  0x37   : > { %1319 = vmatmul.mubr.msk.f32.gmra.mxu0 %vm370_vm2, %v356_v13  ;;  %1350 = vmatprep.mubr.msk.f32.mxu1 %vm645_vm1, %v359_v16 }
  0x38   : > { %1321 = vmatprep.mubr.msk.f32.mxu0 %vm370_vm2, %v357_v14 }
  0x3a   : > { %1351 = vmatmul.mubr.msk.f32.gmra.mxu1 %vm645_vm1, %v360_v17 }
  0x3b   : > { %1322 = vmatmul.mubr.msk.f32.gmra.mxu0 %vm370_vm2, %v358_v15  ;;  %1353 = vmatprep.mubr.msk.f32.mxu1 %vm645_vm1, %v361_v18 }
  0x3c   : > { %1324 = vmatprep.mubr.msk.f32.mxu0 %vm370_vm2, %v359_v16 }
  0x3e   : > { %1354 = vmatmul.mubr.msk.f32.gmra.mxu1 %vm645_vm1, %v362_v19 }
  0x3f   : > { %1325 = vmatmul.mubr.msk.f32.gmra.mxu0 %vm370_vm2, %v360_v17  ;;  %1356 = vmatprep.mubr.msk.f32.mxu1 %vm645_vm1, %v363_v20 }
  0x40   : > { %1327 = vmatprep.mubr.msk.f32.mxu0 %vm370_vm2, %v361_v18 }
  0x42   : > { %1357 = vmatmul.mubr.msk.f32.gmra.mxu1 %vm645_vm1, %v364_v21 }
  0x43   : > { %1328 = vmatmul.mubr.msk.f32.gmra.mxu0 %vm370_vm2, %v362_v19 }
  0x44   : > { %1330 = vmatprep.mubr.msk.f32.mxu0 %vm370_vm2, %v363_v20 }
  0x47   : > { %1331 = vmatmul.mubr.msk.f32.gmra.mxu0 %vm370_vm2, %v364_v21 }
  0xe6   : > { %v1337_v22 = vpop.f32.mrf.mxu1 }
  0xe7   : > { %827 = vst [vmem:[%s1812_s26 + $0x8] sm:$0xff] %v1337_v22  ;;  %v865_v25 = vmul.f32 %v1337_v22, %v1337_v22 }
  0xe8   : > { %v747_v24 = vpop.f32.mrf.mxu1 }
  0xe9   : > { %826 = vst [vmem:[%s1812_s26] sm:$0xff] %v747_v24  ;;  %v864_v26 = vmul.f32 %v747_v24, %v747_v24  ;;  %v842_v29 = vadd.f32 %v1337_v22, %v747_v24 }
  0xea   : > { %v1340_v28 = vpop.f32.mrf.mxu1 }
  0xeb   : > { %v1311_v23 = vpop.f32.mrf.mxu0  ;;  %829 = vst [vmem:[%s1812_s26 + $0x18] sm:$0xff] %v1340_v28  ;;  %v880_v34 = vadd.f32 %v865_v25, %v864_v26  ;;  %v867_v38 = vmul.f32 %v1340_v28, %v1340_v28 }
  0xec   : > { %569 = vst [vmem:[%s1815_s12 + $0x8] sm:$0xff] %v1311_v23  ;;  %v607_v31 = vmul.f32 %v1311_v23, %v1311_v23  ;;  %v757_v33 = vpop.f32.mrf.mxu1 }
  0xed   : > { %v489_v27 = vpop.f32.mrf.mxu0  ;;  %828 = vst [vmem:[%s1812_s26 + $0x10] sm:$0xff] %v757_v33  ;;  %v843_v36 = vadd.f32 %v842_v29, %v757_v33  ;;  %v866_v37 = vmul.f32 %v757_v33, %v757_v33 }
  0xee   : > { %568 = vst [vmem:[%s1815_s12] sm:$0xff] %v489_v27  ;;  %v606_v30 = vmul.f32 %v489_v27, %v489_v27  ;;  %v584_v35 = vadd.f32 %v1311_v23, %v489_v27  ;;  %v1343_v40 = vpop.f32.mrf.mxu1 }
  0xef   : > { %v1314_v32 = vpop.f32.mrf.mxu0  ;;  %v881_v42 = vadd.f32 %v880_v34, %v866_v37  ;;  %831 = vst [vmem:[%s1812_s26 + $0x28] sm:$0xff] %v1343_v40  ;;  %v844_v47 = vadd.f32 %v1340_v28, %v843_v36  ;;  %v869_v56 = vmul.f32 %v1343_v40, %v1343_v40 }
  0xf0   : > { %571 = vst [vmem:[%s1815_s12 + $0x18] sm:$0xff] %v1314_v32  ;;  %v622_v41 = vadd.f32 %v607_v31, %v606_v30  ;;  %v767_v46 = vpop.f32.mrf.mxu1  ;;  %v609_v48 = vmul.f32 %v1314_v32, %v1314_v32 }
  0xf1   : > { %v499_v39 = vpop.f32.mrf.mxu0  ;;  %830 = vst [vmem:[%s1812_s26 + $0x20] sm:$0xff] %v767_v46  ;;  %v868_v50 = vmul.f32 %v767_v46, %v767_v46  ;;  %v882_v51 = vadd.f32 %v881_v42, %v867_v38  ;;  %v845_v52 = vadd.f32 %v844_v47, %v767_v46 }
  0xf2   : > { %570 = vst [vmem:[%s1815_s12 + $0x10] sm:$0xff] %v499_v39  ;;  %v585_v43 = vadd.f32 %v584_v35, %v499_v39  ;;  %v608_v44 = vmul.f32 %v499_v39, %v499_v39  ;;  %v1346_v55 = vpop.f32.mrf.mxu1 }
  0xf3   : > { %v1317_v45 = vpop.f32.mrf.mxu0  ;;  %v883_v57 = vadd.f32 %v882_v51, %v868_v50  ;;  %833 = vst [vmem:[%s1812_s26 + $0x38] sm:$0xff] %v1346_v55  ;;  %v846_v63 = vadd.f32 %v1343_v40, %v845_v52  ;;  %v871_v8 = vmul.f32 %v1346_v55, %v1346_v55 }
  0xf4   : > { %v623_v49 = vadd.f32 %v622_v41, %v608_v44  ;;  %573 = vst [vmem:[%s1815_s12 + $0x28] sm:$0xff] %v1317_v45  ;;  %v586_v54 = vadd.f32 %v1314_v32, %v585_v43  ;;  %v777_v62 = vpop.f32.mrf.mxu1  ;;  %v611_v0 = vmul.f32 %v1317_v45, %v1317_v45 }
  0xf5   : > { %v509_v53 = vpop.f32.mrf.mxu0  ;;  %832 = vst [vmem:[%s1812_s26 + $0x30] sm:$0xff] %v777_v62  ;;  %v870_v2 = vmul.f32 %v777_v62, %v777_v62  ;;  %v884_v3 = vadd.f32 %v883_v57, %v869_v56  ;;  %v847_v4 = vadd.f32 %v846_v63, %v777_v62 }
  0xf6   : > { %572 = vst [vmem:[%s1815_s12 + $0x20] sm:$0xff] %v509_v53  ;;  %v610_v58 = vmul.f32 %v509_v53, %v509_v53  ;;  %v624_v59 = vadd.f32 %v623_v49, %v609_v48  ;;  %v587_v60 = vadd.f32 %v586_v54, %v509_v53  ;;  %v1349_v7 = vpop.f32.mrf.mxu1 }
  0xf7   : > { %v1320_v61 = vpop.f32.mrf.mxu0  ;;  %v885_v9 = vadd.f32 %v884_v3, %v870_v2  ;;  %835 = vst [vmem:[%s1812_s26 + $0x48] sm:$0xff] %v1349_v7  ;;  %v848_v15 = vadd.f32 %v1346_v55, %v847_v4  ;;  %v873_v24 = vmul.f32 %v1349_v7, %v1349_v7 }
  0xf8   : > { %v625_v1 = vadd.f32 %v624_v59, %v610_v58  ;;  %575 = vst [vmem:[%s1815_s12 + $0x38] sm:$0xff] %v1320_v61  ;;  %v588_v6 = vadd.f32 %v1317_v45, %v587_v60  ;;  %v787_v14 = vpop.f32.mrf.mxu1  ;;  %v613_v16 = vmul.f32 %v1320_v61, %v1320_v61 }
  0xf9   : > { %v519_v5 = vpop.f32.mrf.mxu0  ;;  %834 = vst [vmem:[%s1812_s26 + $0x40] sm:$0xff] %v787_v14  ;;  %v872_v18 = vmul.f32 %v787_v14, %v787_v14  ;;  %v886_v19 = vadd.f32 %v885_v9, %v871_v8  ;;  %v849_v20 = vadd.f32 %v848_v15, %v787_v14 }
  0xfa   : > { %574 = vst [vmem:[%s1815_s12 + $0x30] sm:$0xff] %v519_v5  ;;  %v612_v10 = vmul.f32 %v519_v5, %v519_v5  ;;  %v626_v11 = vadd.f32 %v625_v1, %v611_v0  ;;  %v589_v12 = vadd.f32 %v588_v6, %v519_v5  ;;  %v1352_v23 = vpop.f32.mrf.mxu1 }
  0xfb   : > { %v1323_v13 = vpop.f32.mrf.mxu0  ;;  %v887_v25 = vadd.f32 %v886_v19, %v872_v18  ;;  %837 = vst [vmem:[%s1812_s26 + $0x58] sm:$0xff] %v1352_v23  ;;  %v850_v31 = vadd.f32 %v1349_v7, %v849_v20  ;;  %v875_v40 = vmul.f32 %v1352_v23, %v1352_v23 }
  0xfc   : > { %v627_v17 = vadd.f32 %v626_v11, %v612_v10  ;;  %577 = vst [vmem:[%s1815_s12 + $0x48] sm:$0xff] %v1323_v13  ;;  %v590_v22 = vadd.f32 %v1320_v61, %v589_v12  ;;  %v797_v30 = vpop.f32.mrf.mxu1  ;;  %v615_v32 = vmul.f32 %v1323_v13, %v1323_v13 }
  0xfd   : > { %v529_v21 = vpop.f32.mrf.mxu0  ;;  %836 = vst [vmem:[%s1812_s26 + $0x50] sm:$0xff] %v797_v30  ;;  %v874_v34 = vmul.f32 %v797_v30, %v797_v30  ;;  %v888_v35 = vadd.f32 %v887_v25, %v873_v24  ;;  %v851_v36 = vadd.f32 %v850_v31, %v797_v30 }
  0xfe   : > { %576 = vst [vmem:[%s1815_s12 + $0x40] sm:$0xff] %v529_v21  ;;  %v614_v26 = vmul.f32 %v529_v21, %v529_v21  ;;  %v628_v27 = vadd.f32 %v627_v17, %v613_v16  ;;  %v591_v28 = vadd.f32 %v590_v22, %v529_v21  ;;  %v1355_v39 = vpop.f32.mrf.mxu1 }
  0xff   : > { %v1326_v29 = vpop.f32.mrf.mxu0  ;;  %v889_v41 = vadd.f32 %v888_v35, %v874_v34  ;;  %839 = vst [vmem:[%s1812_s26 + $0x68] sm:$0xff] %v1355_v39  ;;  %v852_v47 = vadd.f32 %v1352_v23, %v851_v36  ;;  %v877_v56 = vmul.f32 %v1355_v39, %v1355_v39 }
 0x100   : > { %v629_v33 = vadd.f32 %v628_v27, %v614_v26  ;;  %579 = vst [vmem:[%s1815_s12 + $0x58] sm:$0xff] %v1326_v29  ;;  %v592_v38 = vadd.f32 %v1323_v13, %v591_v28  ;;  %v807_v46 = vpop.f32.mrf.mxu1  ;;  %v617_v48 = vmul.f32 %v1326_v29, %v1326_v29 }
 0x101   : > { %v539_v37 = vpop.f32.mrf.mxu0  ;;  %838 = vst [vmem:[%s1812_s26 + $0x60] sm:$0xff] %v807_v46  ;;  %v876_v50 = vmul.f32 %v807_v46, %v807_v46  ;;  %v890_v51 = vadd.f32 %v889_v41, %v875_v40  ;;  %v853_v52 = vadd.f32 %v852_v47, %v807_v46 }
 0x102   : > { %578 = vst [vmem:[%s1815_s12 + $0x50] sm:$0xff] %v539_v37  ;;  %v616_v42 = vmul.f32 %v539_v37, %v539_v37  ;;  %v630_v43 = vadd.f32 %v629_v33, %v615_v32  ;;  %v593_v44 = vadd.f32 %v592_v38, %v539_v37  ;;  %v1358_v55 = vpop.f32.mrf.mxu1 }
 0x103   : > { %v1329_v45 = vpop.f32.mrf.mxu0  ;;  %v891_v57 = vadd.f32 %v890_v51, %v876_v50  ;;  %841 = vst [vmem:[%s1812_s26 + $0x78] sm:$0xff] %v1358_v55  ;;  %v854_v63 = vadd.f32 %v1355_v39, %v853_v52 }
 0x104   : > { %v631_v49 = vadd.f32 %v630_v43, %v616_v42  ;;  %581 = vst [vmem:[%s1815_s12 + $0x68] sm:$0xff] %v1329_v45  ;;  %v594_v54 = vadd.f32 %v1326_v29, %v593_v44  ;;  %v817_v62 = vpop.f32.mrf.mxu1  ;;  %v619_v0 = vmul.f32 %v1329_v45, %v1329_v45 }
 0x105   : > { %v549_v53 = vpop.f32.mrf.mxu0  ;;  %840 = vst [vmem:[%s1812_s26 + $0x70] sm:$0xff] %v817_v62  ;;  %v878_v2 = vmul.f32 %v817_v62, %v817_v62  ;;  %v892_v3 = vadd.f32 %v891_v57, %v877_v56  ;;  %v855_v4 = vadd.f32 %v854_v63, %v817_v62  ;;  %s1629_s26 = smov [#allocation7]  }
 0x106   : > { %580 = vst [vmem:[%s1815_s12 + $0x60] sm:$0xff] %v549_v53  ;;  %v618_v58 = vmul.f32 %v549_v53, %v549_v53  ;;  %v632_v59 = vadd.f32 %v631_v49, %v617_v48  ;;  %v595_v60 = vadd.f32 %v594_v54, %v549_v53  ;;  %s1429_s1 = sshll.u32 %s1629_s26, 4  ;;  %s1430_s1 = int_to_ptr.vmem [resolvable:$false] %s1429_s1 }
 0x107   : > { %v1858_v61 = vpop.f32.mrf.mxu0  ;;  %s1431_s2 = scalar_lea.vmem %s1430_s1, 4096  ;;  %p1432_p0 = scmp.lt.s32.totalorder %s1856_s18, %s1430_s1 }
 0x108   : > { %v633_v1 = vadd.f32 %v632_v59, %v618_v58  ;;  %583 = vst [vmem:[%s1815_s12 + $0x78] sm:$0xff] %v1858_v61  ;;  %v596_v6 = vadd.f32 %v1329_v45, %v595_v60  ;;  %p1433_p1 = scmp.lt.s32.totalorder %s1431_s2, %s1425_s0 }
 0x109   : > { %v559_v5 = vpop.f32.mrf.mxu0 }
 0x10a   : > { %p1434_p2 = por %p1433_p1, %p1432_p0 }
 0x10c   : > { %p1435_p3 = pnand %p1434_p2, %p1428_p13 }
 0x10e   : > { %1438 = shalt.err (!%p1435_p3)
}
 0x10f   : > { %s1439_s17 = scalar_lea.hbm %s1854_s23, 2048  ;;  %s1443_s26 = scalar_lea.hbm %s2111_s6, 8192 }
 0x110   : > { %p1440_p4 = scmp.ne.s32.totalorder %s1854_s23, %s1439_s17  ;;  %p1444_p9 = scmp.lt.s32.totalorder %s1854_s23, %s2111_s6 }
 0x111   : > { %p1445_p10 = scmp.lt.s32.totalorder %s1443_s26, %s1439_s17 }
 0x112   : > { %p1441_p7 = pnand %p1440_p4, %p1722_p5 }
 0x113   : > { %p1446_p11 = por %p1445_p10, %p1444_p9 }
 0x114   : > { %p1442_p8 = pneg %p1441_p7 }
 0x116   : > { %p1447_p12 = pnand %p1446_p11, %p1442_p8 }
 0x118   : > { %1450 = shalt.err (!%p1447_p12)
}
 0x119   : > { %s1630_s0 = smov 128   ;;  %s1631_s1 = smov 8   ;;  %v879_v7 = vmul.f32 %v1358_v55, %v1358_v55  ;;  %v893_v8 = vadd.f32 %v892_v3, %v878_v2  ;;  %582 = vst [vmem:[%s1815_s12 + $0x70] sm:$0xff] %v559_v5  ;;  %v620_v9 = vmul.f32 %v559_v5, %v559_v5  ;;  %v634_v10 = vadd.f32 %v633_v1, %v619_v0 }
 0x11a   : > { %1362 = dma.vmem_to_hbm [thread:$0]  (%p1722_p5), %s1856_s18, 2048, %s1854_s23, %s1874_s10, %s1630_s0, %s1630_s0, %s1631_s1   ;;  %v856_v11 = vadd.f32 %v1358_v55, %v855_v4  ;;  %v597_v12 = vadd.f32 %v596_v6, %v559_v5 }
 0x11b   : > { %s903_s2 = scalar_lea.sflag [#allocation3], %s1809_s24  ;;  %s1451_s14 = scalar_lea.vmem %s1870_s19, 2048 }
 0x11c   : > { %p1452_p13 = scmp.ne.s32.totalorder %s1870_s19, %s1451_s14  ;;  %s1632_s13 = smov [#allocation2]  }
 0x11d   : > { %s1455_s17 = sshll.u32 %s1632_s13, 4  ;;  %s1456_s17 = int_to_ptr.vmem [resolvable:$false] %s1455_s17 }
 0x11e   : > { %p1453_p0 = pnand %p1452_p13, %p1722_p5  ;;  %s1457_s25 = scalar_lea.vmem %s1456_s17, 4096 }
 0x11f   : > { %p1458_p2 = scmp.lt.s32.totalorder %s1870_s19, %s1456_s17  ;;  %p1459_p3 = scmp.lt.s32.totalorder %s1457_s25, %s1451_s14 }
 0x120   : > { %p1454_p1 = pneg %p1453_p0 }
 0x121   : > { %p1460_p4 = por %p1459_p3, %p1458_p2 }
 0x123   : > { %p1461_p7 = pnand %p1460_p4, %p1454_p1 }
 0x125   : > { %1464 = shalt.err (!%p1461_p7)
}
 0x126   : > { %s1465_s12 = scalar_lea.hbm %s1868_s22, 2048  ;;  %s1469_s20 = scalar_lea.hbm %s2112_s3, 8192 }
 0x127   : > { %p1466_p8 = scmp.ne.s32.totalorder %s1868_s22, %s1465_s12  ;;  %p1470_p11 = scmp.lt.s32.totalorder %s1868_s22, %s2112_s3 }
 0x128   : > { %p1471_p12 = scmp.lt.s32.totalorder %s1469_s20, %s1465_s12 }
 0x129   : > { %p1467_p9 = pnand %p1466_p8, %p1722_p5 }
 0x12a   : > { %p1472_p13 = por %p1471_p12, %p1470_p11 }
 0x12b   : > { %p1468_p10 = pneg %p1467_p9 }
 0x12d   : > { %p1473_p0 = pnand %p1472_p13, %p1468_p10 }
 0x12f   : > { %1476 = shalt.err (!%p1473_p0)
}
 0x130   : > { %1359 = dma.vmem_to_hbm [thread:$0]  (%p1722_p5), %s1870_s19, 2048, %s1868_s22, %s903_s2, %s1630_s0, %s1630_s0, %s1631_s1   ;;  %v621_v13 = vmul.f32 %v1858_v61, %v1858_v61  ;;  %v894_v14 = vadd.f32 %v893_v8, %v879_v7  ;;  %v635_v15 = vadd.f32 %v634_v10, %v620_v9  ;;  %v857_v16 = vrot.slane %v856_v11, 4 }
 0x131   : > { %v598_v17 = vadd.f32 %v1858_v61, %v597_v12  ;;  %s2098_s19 = scalar_lea.vmem [#allocation4], %s1809_s24  ;;  %s1935_s2 = scalar_lea.hbm %s2090_s4, %s1739_s21 }
 0x132   : > { %v895_v18 = vrot.slane %v894_v14, 4  ;;  %v636_v19 = vadd.f32 %v635_v15, %v621_v13  ;;  %v858_v20 = vadd.f32 %v857_v16, %v856_v11  ;;  %s953_s22 = sshll.u32 %s2098_s19, 4  ;;  %s334_s14 = scalar_lea.vmem [#allocation9], %s1809_s24  ;;  %s1938_s22 = int_to_ptr.vmem [resolvable:$true] %s953_s22 }
 0x133   : > { %v599_v21 = vrot.slane %v598_v17, 4  ;;  %s995_s17 = sshll.u32 %s334_s14, 4  ;;  %s2099_s25 = scalar_lea.vmem [#allocation10], %s1809_s24  ;;  %s1952_s17 = int_to_ptr.vmem [resolvable:$true] %s995_s17 }
 0x134   : > { %v896_v22 = vadd.f32 %v895_v18, %v894_v14  ;;  %v637_v23 = vrot.slane %v636_v19, 4  ;;  %v859_v24 = vrot.slane %v858_v20, 2  ;;  %s1008_s12 = sshll.u32 %s2099_s25, 4  ;;  %s2097_s18 = scalar_lea.vmem [#allocation6], %s1809_s24  ;;  %s1960_s12 = int_to_ptr.vmem [resolvable:$true] %s1008_s12 }
 0x135   : > { %v600_v25 = vadd.f32 %v599_v21, %v598_v17  ;;  %s966_s23 = sshll.u32 %s2097_s18, 4  ;;  %s1950_s13 = scalar_lea.hbm %s2093_s7, %s1739_s21  ;;  %s1968_s23 = int_to_ptr.vmem [resolvable:$true] %s966_s23 }
 0x136   : > { %v638_v26 = vadd.f32 %v637_v23, %v636_v19  ;;  %v897_v27 = vrot.slane %v896_v22, 2  ;;  %v860_v28 = vadd.f32 %v859_v24, %v858_v20  ;;  %s1958_s18 = scalar_lea.hbm %s2094_s8, %s1739_s21  ;;  %s1966_s19 = scalar_lea.hbm %s2091_s5, %s1739_s21 }
 0x137   : > { %v601_v29 = vrot.slane %v600_v25, 2  ;;  %s1477_s25 = scalar_lea.vmem %s1952_s17, 16  ;;  %s1633_s0 = smov [#allocation9]  }
 0x138   : > { %v639_v30 = vrot.slane %v638_v26, 2  ;;  %v898_v31 = vadd.f32 %v897_v27, %v896_v22  ;;  %v861_v33 = vrot.slane %v860_v28, 1  ;;  %p1478_p1 = scmp.ne.s32.totalorder %s1952_s17, %s1477_s25  ;;  %s1481_s1 = sshll.u32 %s1633_s0, 4  ;;  %s1482_s1 = int_to_ptr.vmem [resolvable:$false] %s1481_s1 }
 0x139   : > { %v602_v32 = vadd.f32 %v601_v29, %v600_v25  ;;  %s1483_s3 = scalar_lea.vmem %s1482_s1, 32  ;;  %p1484_p4 = scmp.lt.s32.totalorder %s1952_s17, %s1482_s1 }
 0x13a   : > { %v640_v34 = vadd.f32 %v639_v30, %v638_v26  ;;  %v899_v35 = vrot.slane %v898_v31, 1  ;;  %v862_v37 = vadd.f32 %v861_v33, %v860_v28  ;;  %p1479_p2 = pnand %p1478_p1, %p1722_p5  ;;  %p1485_p7 = scmp.lt.s32.totalorder %s1483_s3, %s1477_s25 }
 0x13b   : > { %v603_v36 = vrot.slane %v602_v32, 1 }
 0x13c   : > { %v641_v38 = vrot.slane %v640_v34, 1  ;;  %v900_v39 = vadd.f32 %v899_v35, %v898_v31  ;;  %863 = vst [vmem:[%s334_s14] sm:$0x1] %v862_v37  ;;  %p1480_p3 = pneg %p1479_p2  ;;  %p1486_p8 = por %p1485_p7, %p1484_p4 }
 0x13d   : > { %v604_v40 = vadd.f32 %v603_v36, %v602_v32 }
 0x13e   : > { %v1970_v41 = vadd.f32 %v641_v38, %v640_v34  ;;  %p1487_p9 = pnand %p1486_p8, %p1480_p3 }
 0x140   : > { %1490 = shalt.err (!%p1487_p9)
}
 0x141   : > { %s1491_s21 = scalar_lea.hbm %s1950_s13, 16  ;;  %s1495_s26 = scalar_lea.hbm %s2093_s7, 64 }
 0x142   : > { %p1492_p10 = scmp.ne.s32.totalorder %s1950_s13, %s1491_s21  ;;  %p1496_p13 = scmp.lt.s32.totalorder %s1950_s13, %s2093_s7 }
 0x143   : > { %p1497_p0 = scmp.lt.s32.totalorder %s1495_s26, %s1491_s21 }
 0x144   : > { %p1493_p11 = pnand %p1492_p10, %p1722_p5 }
 0x145   : > { %p1498_p1 = por %p1497_p0, %p1496_p13 }
 0x146   : > { %p1494_p12 = pneg %p1493_p11 }
 0x148   : > { %p1499_p2 = pnand %p1498_p1, %p1494_p12 }
 0x14a   : > { %1502 = shalt.err (!%p1499_p2)
}
 0x14b   : > { %1363 = dma.vmem_to_hbm [thread:$0]  (%p1722_p5), %s1952_s17, 16, %s1950_s13, %s1874_s10  }
 0x14c   : > { %s2113_s3 = scalar_lea.vmem [#allocation10], %s1809_s24  ;;  %s2114_s6 = scalar_lea.vmem [#allocation4], %s1809_s24 }
 0x14d   : > { %901 = vst [vmem:[%s2113_s3] sm:$0x1] %v900_v39  ;;  %605 = vst [vmem:[%s2114_s6] sm:$0x1] %v604_v40  ;;  %s925_s25 = scalar_lea.sflag [#allocation11], %s1809_s24  ;;  %s1503_s1 = scalar_lea.vmem %s1960_s12, 16 }
 0x14e   : > { %p1504_p3 = scmp.ne.s32.totalorder %s1960_s12, %s1503_s1  ;;  %s1634_s21 = smov [#allocation10]  }
 0x14f   : > { %s1507_s14 = sshll.u32 %s1634_s21, 4  ;;  %s1508_s14 = int_to_ptr.vmem [resolvable:$false] %s1507_s14 }
 0x150   : > { %p1505_p4 = pnand %p1504_p3, %p1722_p5  ;;  %s1509_s20 = scalar_lea.vmem %s1508_s14, 32 }
 0x151   : > { %p1510_p8 = scmp.lt.s32.totalorder %s1960_s12, %s1508_s14  ;;  %p1511_p9 = scmp.lt.s32.totalorder %s1509_s20, %s1503_s1 }
 0x152   : > { %p1506_p7 = pneg %p1505_p4 }
 0x153   : > { %p1512_p10 = por %p1511_p9, %p1510_p8 }
 0x155   : > { %p1513_p11 = pnand %p1512_p10, %p1506_p7 }
 0x157   : > { %1516 = shalt.err (!%p1513_p11)
}
 0x158   : > { %s1517_s10 = scalar_lea.hbm %s1958_s18, 16  ;;  %s1521_s26 = scalar_lea.hbm %s2094_s8, 64 }
 0x159   : > { %p1518_p12 = scmp.ne.s32.totalorder %s1958_s18, %s1517_s10  ;;  %p1522_p1 = scmp.lt.s32.totalorder %s1958_s18, %s2094_s8 }
 0x15a   : > { %p1523_p2 = scmp.lt.s32.totalorder %s1521_s26, %s1517_s10 }
 0x15b   : > { %p1519_p13 = pnand %p1518_p12, %p1722_p5 }
 0x15c   : > { %p1524_p3 = por %p1523_p2, %p1522_p1 }
 0x15d   : > { %p1520_p0 = pneg %p1519_p13 }
 0x15f   : > { %p1525_p4 = pnand %p1524_p3, %p1520_p0 }
 0x161   : > { %1528 = shalt.err (!%p1525_p4)
}
 0x162   : > { %1364 = dma.vmem_to_hbm [thread:$0]  (%p1722_p5), %s1960_s12, 16, %s1958_s18, %s925_s25  }
 0x163   : > { %s2115_s6 = sand.u32 1, %s1703_s9   ;;  %s1529_s21 = scalar_lea.vmem %s1938_s22, 16 }
 0x164   : > { %s2020_s1 = scalar_lea.sflag [#allocation5], %s2115_s6  ;;  %p1530_p7 = scmp.ne.s32.totalorder %s1938_s22, %s1529_s21 }
 0x165   : > { %s1635_s14 = smov [#allocation4]  }
 0x166   : > { %p1531_p8 = pnand %p1530_p7, %p1722_p5  ;;  %s1533_s20 = sshll.u32 %s1635_s14, 4  ;;  %s1534_s20 = int_to_ptr.vmem [resolvable:$false] %s1533_s20 }
 0x167   : > { %s1535_s10 = scalar_lea.vmem %s1534_s20, 32  ;;  %p1536_p10 = scmp.lt.s32.totalorder %s1938_s22, %s1534_s20 }
 0x168   : > { %p1532_p9 = pneg %p1531_p8  ;;  %p1537_p11 = scmp.lt.s32.totalorder %s1535_s10, %s1529_s21 }
 0x16a   : > { %p1538_p12 = por %p1537_p11, %p1536_p10 }
 0x16c   : > { %p1539_p13 = pnand %p1538_p12, %p1532_p9 }
 0x16e   : > { %1542 = shalt.err (!%p1539_p13)
}
 0x16f   : > { %s1543_s9 = scalar_lea.hbm %s1935_s2, 16  ;;  %s1547_s25 = scalar_lea.hbm %s2090_s4, 64 }
 0x170   : > { %p1544_p0 = scmp.ne.s32.totalorder %s1935_s2, %s1543_s9  ;;  %p1548_p3 = scmp.lt.s32.totalorder %s1935_s2, %s2090_s4 }
 0x171   : > { %p1549_p4 = scmp.lt.s32.totalorder %s1547_s25, %s1543_s9 }
 0x172   : > { %p1545_p1 = pnand %p1544_p0, %p1722_p5 }
 0x173   : > { %p1550_p7 = por %p1549_p4, %p1548_p3 }
 0x174   : > { %p1546_p2 = pneg %p1545_p1 }
 0x176   : > { %p1551_p8 = pnand %p1550_p7, %p1546_p2 }
 0x178   : > { %1554 = shalt.err (!%p1551_p8)
}
 0x179   : > { %1360 = dma.vmem_to_hbm [thread:$0]  (%p1722_p5), %s1938_s22, 16, %s1935_s2, %s2020_s1  }
 0x17a   : > { %s2116_s26 = scalar_lea.vmem [#allocation6], %s1809_s24  ;;  %s1555_s0 = scalar_lea.vmem %s1968_s23, 16 }
 0x17b   : > { %643 = vst [vmem:[%s2116_s26] sm:$0x1] %v1970_v41  ;;  %p1556_p9 = scmp.ne.s32.totalorder %s1968_s23, %s1555_s0  ;;  %s1636_s3 = smov [#allocation6]  }
 0x17c   : > { %s1559_s6 = sshll.u32 %s1636_s3, 4  ;;  %s1560_s6 = int_to_ptr.vmem [resolvable:$false] %s1559_s6 }
 0x17d   : > { %p1557_p10 = pnand %p1556_p9, %p1722_p5  ;;  %s1561_s21 = scalar_lea.vmem %s1560_s6, 32 }
 0x17e   : > { %p1562_p12 = scmp.lt.s32.totalorder %s1968_s23, %s1560_s6  ;;  %p1563_p13 = scmp.lt.s32.totalorder %s1561_s21, %s1555_s0 }
 0x17f   : > { %p1558_p11 = pneg %p1557_p10 }
 0x180   : > { %p1564_p0 = por %p1563_p13, %p1562_p12 }
 0x182   : > { %p1565_p1 = pnand %p1564_p0, %p1558_p11 }
 0x184   : > { %1568 = shalt.err (!%p1565_p1)
}
 0x185   : > { %s1569_s24 = scalar_lea.hbm %s1966_s19, 16  ;;  %s1573_s14 = scalar_lea.hbm %s2091_s5, 64 }
 0x186   : > { %p1570_p2 = scmp.ne.s32.totalorder %s1966_s19, %s1569_s24  ;;  %p1574_p7 = scmp.lt.s32.totalorder %s1966_s19, %s2091_s5 }
 0x187   : > { %p1575_p8 = scmp.lt.s32.totalorder %s1573_s14, %s1569_s24 }
 0x188   : > { %p1571_p3 = pnand %p1570_p2, %p1722_p5 }
 0x189   : > { %p1576_p9 = por %p1575_p8, %p1574_p7 }
 0x18a   : > { %p1572_p4 = pneg %p1571_p3 }
 0x18c   : > { %p1577_p10 = pnand %p1576_p9, %p1572_p4 }
 0x18e   : > { %1580 = shalt.err (!%p1577_p10)
}
 0x18f   : > { %1361 = dma.vmem_to_hbm [thread:$0]  (%p1722_p5), %s1968_s23, 16, %s1966_s19, %s2020_s1  }
 0x190 PF: > { %p1390_p11 = scmp.ge.s32.totalorder %s1627_s30, 2  ;;  %s1020_s9 = sand.u32 1, %s1615_s27  }
 0x191   : > { %s1021_s12 = scalar_lea.sflag [#allocation3], %s1020_s9 }
 0x192   : > { %p1372_p12 = pnand %p1390_p11, %p1726_p6 }
 0x194   : > { %p1373_p13 = pneg %p1372_p12 }
 0x196   : > { %1598 = dma.done.wait (%p1373_p13), %s1021_s12, 2048  }
 0x197   : > { %1600 = vsyncadd (%p1373_p13), %s1021_s12, 4294965248  ;;  %s2117_s18 = sadd.s32 4294967294, %s1627_s30  }
 0x198   : > { %s1029_s25 = sand.u32 1, %s2117_s18  }
 0x199   : > { %s1030_s15 = scalar_lea.sflag [#allocation5], %s1029_s25 }
 0x19a   : > { %1602 = dma.done.wait (%p1373_p13), %s1030_s15, 32  }
 0x19b   : > { %1604 = vsyncadd (%p1373_p13), %s1030_s15, 4294967264  ;;  %s1046_s17 = scalar_lea.sflag [#allocation8], %s1029_s25 }
 0x19c   : > { %1606 = dma.done.wait (%p1373_p13), %s1046_s17, 2064  }
 0x19d   : > { %1608 = vsyncadd (%p1373_p13), %s1046_s17, 4294965232  ;;  %s1063_s19 = scalar_lea.sflag [#allocation11], %s1020_s9 }
 0x19e   : > { %1610 = dma.done.wait (%p1373_p13), %s1063_s19, 16  }
 0x19f   : > { %1612 = vsyncadd (%p1373_p13), %s1063_s19, 4294967280  ;;  %s2118_s16 = sld [smem:[#allocation16_spill]]  ;;  %p28_p5 = scmp.ge.s32.totalorder %s1707_s11, 6  }
 0x1a0   : > { %s2119_s27 = smov %s1619_s28  ;;  %s2120_s28 = smov %s1623_s29 }
 0x1a1   : > { %s2122_s30 = smov %s1707_s11  ;;  %30 = sbr.rel (!%p28_p5) target bundleno = 15 (0xf), region = 148 }
 0x1a5   : > { %s2121_s29 = smov %s2118_s16 }
 0x1a6   :  { %1067 = vsyncpa [#allocation3], 1 }
 0x1a7   :  { %1069 = vsyncpa [#allocation3 + $0x1], 1 }
 0x1a8   :  { %1070 = vsyncpa [#allocation5], 1 }
 0x1a9   :  { %1072 = vsyncpa [#allocation5 + $0x1], 1 }
 0x1aa   :  { %1073 = vsyncpa [#allocation8], 1 }
 0x1ab   :  { %1075 = vsyncpa [#allocation8 + $0x1], 1 }
 0x1ac   :  { %1076 = vsyncpa [#allocation11], 1 }
 0x1ad   :  { %1078 = vsyncpa [#allocation11 + $0x1], 1 }

</bundles_post_ra>
